<compile_context>
chip_gen: v7x
topology: tpu7x:2x2x1
jax: 0.10.0
libtpu: 0.0.40
codegen_flags: <defaults>
</compile_context>

<pallas_src>
import math

import jax
import jax.numpy as jnp
from jax.experimental import pallas as pl
from jax.experimental.pallas import tpu as pltpu

VMEM_SPEC = pl.BlockSpec(memory_space=pltpu.MemorySpace.VMEM)
SMEM_SPEC = pl.BlockSpec(memory_space=pltpu.MemorySpace.SMEM)


def _rup(x, m):
    return ((x + m - 1) // m) * m


# ----------------------------------------------------------------------------
# Fused kernel: all GINConv layers + readout head in one pallas_call.
#   per layer l:  h = BN_l( relu( relu( ((1+eps_l)*h + adj@h) @ W1_l + b1_l )
#                                 @ W2_l + b2_l ) )          (BN folded, eval)
#   head:         pooled = pool @ h
#                 hh     = relu(pooled @ Wl1 + bl1)           (dropout eval = id)
#                 out    = log_softmax(hh @ Wl2 + bl2)
# ----------------------------------------------------------------------------
def gin_fused_kernel(ope_ref,        # SMEM (L,)            f32 : 1 + eps_l
                     x_ref,          # VMEM [Np, Hp]        f32 : node features
                     adj_ref,        # VMEM [Np, Np]        bf16: dense adjacency (exact small ints)
                     pool_ref,       # VMEM [Gp, Np]        bf16: global_add_pool 0/1 rows
                     convw_ref,      # VMEM [2L, Hp, Hp]    bf16: W1_0, W2_0, W1_1, W2_1, ...
                     convv_ref,      # VMEM [4L, Hp]        f32 : b1, b2, bn_scale, bn_shift per layer
                     l1w_ref,        # VMEM [Hp, Hp]        bf16
                     l2w_ref,        # VMEM [Hp, Cp]        bf16
                     headb_ref,      # VMEM [2, max(Hp,Cp)] f32 : lin1 bias / lin2 bias (-1e30 pad)
                     out_ref):       # VMEM [Gp, Cp]        f32 : log_softmax output
    num_layers = convw_ref.shape[0] // 2
    Hp = x_ref.shape[1]
    Cp = out_ref.shape[1]

    h = x_ref[...]                                  # [Np, Hp] f32, stays on-chip

    for l in range(num_layers):                     # static unroll (small L)
        # Re-read adj every layer (do NOT hoist above the loop): VMEM reloads
        # are nearly free, and a value held live across L layers x 3 matmuls
        # raises vreg pressure / spill risk under static unrolling.
        agg = jnp.dot(adj_ref[...], h.astype(jnp.bfloat16),
                      preferred_element_type=jnp.float32)           # [Np, Hp]
        z = ope_ref[l] * h + agg                                    # f32 VPU
        z = jnp.dot(z.astype(jnp.bfloat16), convw_ref[2 * l],
                    preferred_element_type=jnp.float32) + convv_ref[4 * l]
        z = jnp.maximum(z, 0.0)
        z = jnp.dot(z.astype(jnp.bfloat16), convw_ref[2 * l + 1],
                    preferred_element_type=jnp.float32) + convv_ref[4 * l + 1]
        z = jnp.maximum(z, 0.0)
        # Eval-mode BN folded to scale/shift.
        h = z * convv_ref[4 * l + 2] + convv_ref[4 * l + 3]
        # NOTE: padded node rows (N..Np) pick up nonzero activations via the
        # bias broadcasts; this is harmless ONLY because adj's and pool's
        # padded columns are zero.  Do not add self-loops / degree norm /
        # mean-pool in the padding without re-zeroing those rows.

    # global_add_pool via 0/1 pool matrix, then MLP head + log_softmax.
    pooled = jnp.dot(pool_ref[...], h.astype(jnp.bfloat16),
                     preferred_element_type=jnp.float32)            # [Gp, Hp]
    hh = jnp.dot(pooled.astype(jnp.bfloat16), l1w_ref[...],
                 preferred_element_type=jnp.float32) + headb_ref[0][:Hp]
    hh = jnp.maximum(hh, 0.0)
    # dropout(p=0.5) in eval mode is identity.
    # headb row 1 keeps -1e30 on padded class columns (must stay f32 so exp
    # underflows to exactly 0 in the log_softmax below).
    logits = jnp.dot(hh.astype(jnp.bfloat16), l2w_ref[...],
                     preferred_element_type=jnp.float32) + headb_ref[1][:Cp]
    m = jnp.max(logits, axis=-1, keepdims=True)
    lse = jnp.log(jnp.sum(jnp.exp(logits - m), axis=-1, keepdims=True)) + m
    out_ref[...] = logits - lse                     # [Gp, Cp] lane-dense store


@jax.jit
def gin_forward(one_plus_eps, x_p, adj_p, pool_p, convw, convv, l1w, l2w, headb):
    Np, Hp = x_p.shape
    L = convw.shape[0] // 2
    Gp = pool_p.shape[0]
    Cp = l2w.shape[1]

    flops = (L * (2 * Np * Np * Hp + 2 * 2 * Np * Hp * Hp)
             + 2 * Gp * Np * Hp + 2 * Gp * Hp * Hp + 2 * Gp * Hp * Cp)
    bytes_acc = sum(int(a.size) * a.dtype.itemsize for a in
                    (one_plus_eps, x_p, adj_p, pool_p, convw, convv,
                     l1w, l2w, headb)) + Gp * Cp * 4

    return pl.pallas_call(
        gin_fused_kernel,
        out_shape=jax.ShapeDtypeStruct((Gp, Cp), jnp.float32),
        in_specs=[SMEM_SPEC] + [VMEM_SPEC] * 8,
        out_specs=VMEM_SPEC,
        # No grid -> dimension_semantics not applicable; total VMEM residency is
        # < 0.5 MiB so the default scoped-VMEM limit is ample (hard 8 MiB cap
        # removed so scaled-up tilings aren't artificially rejected).
        cost_estimate=pl.CostEstimate(flops=flops,
                                      transcendentals=Gp * Cp + Gp,
                                      bytes_accessed=bytes_acc),
    )(one_plus_eps, x_p, adj_p, pool_p, convw, convv, l1w, l2w, headb)


# ----------------------------------------------------------------------------
# Parameter construction (deterministic, in-script) and padding helpers.
# ----------------------------------------------------------------------------
def make_linear(key, fan_in, fan_out):
    k1, k2 = jax.random.split(key)
    bound = 1.0 / math.sqrt(fan_in)
    w = jax.random.uniform(k1, (fan_in, fan_out), jnp.float32, -bound, bound)
    b = jax.random.uniform(k2, (fan_out,), jnp.float32, -bound, bound)
    return w, b


def make_gin_layer(key, fan_in, hidden, eps_val):
    ks = jax.random.split(key, 5)
    w1, b1 = make_linear(ks[0], fan_in, hidden)
    w2, b2 = make_linear(ks[1], hidden, hidden)
    # BatchNorm1d eval-mode parameters (deterministic, non-trivial)
    gamma = 1.0 + 0.1 * jax.random.normal(ks[2], (hidden,), jnp.float32)
    beta = 0.1 * jax.random.normal(ks[3], (hidden,), jnp.float32)
    run_mean = 0.05 * jax.random.normal(ks[4], (hidden,), jnp.float32)
    run_var = jnp.ones((hidden,), jnp.float32)
    bn_scale = gamma / jnp.sqrt(run_var + 1e-5)
    bn_shift = beta - run_mean * bn_scale
    return dict(eps=float(eps_val), w1=w1, b1=b1, w2=w2, b2=b2,
                bn_scale=bn_scale, bn_shift=bn_shift)


def pad2(a, r, c, fill=0.0):
    return jnp.pad(a, ((0, r - a.shape[0]), (0, c - a.shape[1])),
                   constant_values=fill)


def pad1(a, n, fill=0.0):
    return jnp.pad(a, (0, n - a.shape[0]), constant_values=fill)


def reference_forward(x, adj, pool, conv_params, lin1_w, lin1_b, lin2_w, lin2_b):
    """Pure-JAX f32 reference matching the PyTorch module (eval mode)."""
    h = x
    for p in conv_params:
        z = (1.0 + p["eps"]) * h + adj @ h
        z = jnp.maximum(z @ p["w1"] + p["b1"], 0.0)
        z = jnp.maximum(z @ p["w2"] + p["b2"], 0.0)
        h = z * p["bn_scale"] + p["bn_shift"]
    pooled = pool @ h
    hh = jnp.maximum(pooled @ lin1_w + lin1_b, 0.0)
    logits = hh @ lin2_w + lin2_b
    return jax.nn.log_softmax(logits, axis=-1)


if __name__ == "__main__":
    # Small synthetic graph batch consistent with the module's forward:
    #   data.x [N, num_features], data.edge_index [2, E], data.batch [N]
    N, E, G = 32, 64, 2
    num_features, hidden, num_classes, num_layers = 8, 32, 4, 3

    key = jax.random.PRNGKey(0)
    k_x, k_src, k_dst, k_params = jax.random.split(key, 4)

    x = jax.random.normal(k_x, (N, num_features), jnp.float32)
    src = jax.random.randint(k_src, (E,), 0, N)
    dst = jax.random.randint(k_dst, (E,), 0, N)
    edge_index = jnp.stack([src, dst])                               # [2, E]
    batch = jnp.concatenate([jnp.zeros(N // 2, jnp.int32),
                             jnp.ones(N - N // 2, jnp.int32)])       # [N]

    # Glue: densify graph structure for matmul-based aggregation / pooling.
    adj = jnp.zeros((N, N), jnp.float32).at[edge_index[1], edge_index[0]].add(1.0)
    pool = (batch[None, :] == jnp.arange(G)[:, None]).astype(jnp.float32)  # [G, N]

    # Parameters: conv1 (F->H), then (num_layers-1) convs (H->H), then lin1, lin2.
    pkeys = jax.random.split(k_params, num_layers + 2)
    conv_params = [make_gin_layer(pkeys[0], num_features, hidden, 0.05)]
    for i in range(num_layers - 1):
        conv_params.append(make_gin_layer(pkeys[1 + i], hidden, hidden,
                                          0.05 * (i + 2)))
    lin1_w, lin1_b = make_linear(pkeys[num_layers], hidden, hidden)
    lin2_w, lin2_b = make_linear(pkeys[num_layers + 1], hidden, num_classes)

    # ---- Padding (zeros; exact on the real slice) ----------------------------
    # Only true lane dims go to 128; the node dim only needs sublane/packing
    # alignment (32 covers f32 sublane=8 and bf16 packing=16).
    Np = _rup(N, 32)                                   # nodes     -> 32
    Hp = _rup(max(num_features, hidden), 128)          # feat/hid  -> 128 (lane)
    Cp = _rup(num_classes, 128)                        # classes   -> 128 (lane)
    Gp = _rup(G, 8)                                    # graphs    -> 8 (sublane)

    x_p = pad2(x, Np, Hp)                                        # f32
    adj_p = pad2(adj, Np, Np).astype(jnp.bfloat16)               # exact small ints
    pool_p = pad2(pool, Gp, Np).astype(jnp.bfloat16)             # exact 0/1

    # Coalesced parameter arrays (fewer HBM->VMEM DMAs):
    #   convw [2L, Hp, Hp] bf16 : W1_l, W2_l interleaved
    #   convv [4L, Hp]     f32  : b1_l, b2_l, bn_scale_l, bn_shift_l interleaved
    convw = jnp.stack([pad2(w, Hp, Hp) for p in conv_params
                       for w in (p["w1"], p["w2"])]).astype(jnp.bfloat16)
    convv = jnp.stack([pad1(v, Hp) for p in conv_params
                       for v in (p["b1"], p["b2"], p["bn_scale"], p["bn_shift"])])
    one_plus_eps = jnp.array([1.0 + p["eps"] for p in conv_params], jnp.float32)

    l1w = pad2(lin1_w, Hp, Hp).astype(jnp.bfloat16)
    l2w = pad2(lin2_w, Hp, Cp).astype(jnp.bfloat16)
    # Head biases coalesced into one f32 array; -1e30 on padded class columns
    # so log_softmax ignores them exactly (must remain f32).
    HBp = max(Hp, Cp)
    headb = jnp.stack([pad1(pad1(lin1_b, Hp), HBp),
                       pad1(pad1(lin2_b, Cp, fill=-1e30), HBp)])

    out_p = gin_forward(one_plus_eps, x_p, adj_p, pool_p,
                        convw, convv, l1w, l2w, headb)
    out = jax.block_until_ready(out_p)[:G, :num_classes]

    assert out.shape == (G, num_classes)
    assert bool(jnp.all(jnp.isfinite(out)))
    # log_softmax rows should sum (in prob space) to ~1
    assert bool(jnp.all(jnp.abs(jnp.sum(jnp.exp(out), axis=-1) - 1.0) < 1e-4))
    # Compare against f32 pure-JAX reference (loose tolerance: kernel uses bf16
    # MXU operands with f32 accumulation).
    ref = reference_forward(x, adj, pool, conv_params,
                            lin1_w, lin1_b, lin2_w, lin2_b)
    assert bool(jnp.max(jnp.abs(out - ref)) < 0.35)
    print("KERNEL_OK")
</pallas_src>

<mosaic_0001>
module attributes {stable_mosaic.version = 11 : i64} {
  func.func @gin_fused_kernel(%arg0: memref<3xf32, #tpu.memory_space<smem>>, %arg1: memref<32x128xf32, #tpu.memory_space<vmem>>, %arg2: memref<32x32xbf16, #tpu.memory_space<vmem>>, %arg3: memref<8x32xbf16, #tpu.memory_space<vmem>>, %arg4: memref<6x128x128xbf16, #tpu.memory_space<vmem>>, %arg5: memref<12x128xf32, #tpu.memory_space<vmem>>, %arg6: memref<128x128xbf16, #tpu.memory_space<vmem>>, %arg7: memref<128x128xbf16, #tpu.memory_space<vmem>>, %arg8: memref<2x128xf32, #tpu.memory_space<vmem>>, %arg9: memref<8x128xf32, #tpu.memory_space<vmem>>) attributes {dimension_semantics = [], scalar_prefetch = 0 : i64, scratch_operands = 0 : i64, tpu.core_type = #tpu.core_type<tc>} {
    %c0 = arith.constant 0 : index
    %c0_0 = arith.constant 0 : index
    %0 = vector.load %arg1[%c0, %c0_0] : memref<32x128xf32, #tpu.memory_space<vmem>>, vector<32x128xf32>
    %c0_1 = arith.constant 0 : index
    %c0_2 = arith.constant 0 : index
    %1 = vector.load %arg2[%c0_1, %c0_2] : memref<32x32xbf16, #tpu.memory_space<vmem>>, vector<32x32xbf16>
    %2 = arith.truncf %0 : vector<32x128xf32> to vector<32x128xbf16>
    %cst = arith.constant dense<0.000000e+00> : vector<32x128xf32>
    %3 = tpu.matmul %1, %2, %cst {dimension_numbers = #tpu.dot_dimension_numbers<[1], [0], [0], [1], [0, 0, 1, 1], [], []>} : vector<32x32xbf16>, vector<32x128xbf16>, vector<32x128xf32> -> vector<32x128xf32>
    %c0_3 = arith.constant 0 : index
    %4 = memref.load %arg0[%c0_3] : memref<3xf32, #tpu.memory_space<smem>>
    %5 = vector.broadcast %4 : f32 to vector<32x128xf32>
    %6 = arith.mulf %5, %0 : vector<32x128xf32>
    %7 = arith.addf %6, %3 : vector<32x128xf32>
    %8 = arith.truncf %7 : vector<32x128xf32> to vector<32x128xbf16>
    %c0_4 = arith.constant 0 : index
    %c0_5 = arith.constant 0 : index
    %c0_6 = arith.constant 0 : index
    %9 = vector.load %arg4[%c0_4, %c0_5, %c0_6] : memref<6x128x128xbf16, #tpu.memory_space<vmem>>, vector<1x128x128xbf16>
    %10 = vector.shape_cast %9 : vector<1x128x128xbf16> to vector<128x128xbf16>
    %cst_7 = arith.constant dense<0.000000e+00> : vector<32x128xf32>
    %11 = tpu.matmul %8, %10, %cst_7 {dimension_numbers = #tpu.dot_dimension_numbers<[1], [0], [0], [1], [0, 0, 1, 1], [], []>} : vector<32x128xbf16>, vector<128x128xbf16>, vector<32x128xf32> -> vector<32x128xf32>
    %c0_8 = arith.constant 0 : index
    %c0_9 = arith.constant 0 : index
    %12 = vector.load %arg5[%c0_8, %c0_9] : memref<12x128xf32, #tpu.memory_space<vmem>>, vector<1x128xf32>
    %13 = vector.shape_cast %12 : vector<1x128xf32> to vector<128xf32>
    %14 = vector.shape_cast %13 : vector<128xf32> to vector<1x128xf32>
    %15 = vector.broadcast %14 : vector<1x128xf32> to vector<32x128xf32>
    %16 = arith.addf %11, %15 : vector<32x128xf32>
    %cst_10 = arith.constant 0.000000e+00 : f32
    %17 = vector.broadcast %cst_10 : f32 to vector<32x128xf32>
    %18 = arith.maximumf %16, %17 : vector<32x128xf32>
    %19 = arith.truncf %18 : vector<32x128xf32> to vector<32x128xbf16>
    %c1 = arith.constant 1 : index
    %c0_11 = arith.constant 0 : index
    %c0_12 = arith.constant 0 : index
    %20 = vector.load %arg4[%c1, %c0_11, %c0_12] : memref<6x128x128xbf16, #tpu.memory_space<vmem>>, vector<1x128x128xbf16>
    %21 = vector.shape_cast %20 : vector<1x128x128xbf16> to vector<128x128xbf16>
    %cst_13 = arith.constant dense<0.000000e+00> : vector<32x128xf32>
    %22 = tpu.matmul %19, %21, %cst_13 {dimension_numbers = #tpu.dot_dimension_numbers<[1], [0], [0], [1], [0, 0, 1, 1], [], []>} : vector<32x128xbf16>, vector<128x128xbf16>, vector<32x128xf32> -> vector<32x128xf32>
    %c1_14 = arith.constant 1 : index
    %c0_15 = arith.constant 0 : index
    %23 = vector.load %arg5[%c1_14, %c0_15] : memref<12x128xf32, #tpu.memory_space<vmem>>, vector<1x128xf32>
    %24 = vector.shape_cast %23 : vector<1x128xf32> to vector<128xf32>
    %25 = vector.shape_cast %24 : vector<128xf32> to vector<1x128xf32>
    %26 = vector.broadcast %25 : vector<1x128xf32> to vector<32x128xf32>
    %27 = arith.addf %22, %26 : vector<32x128xf32>
    %cst_16 = arith.constant 0.000000e+00 : f32
    %28 = vector.broadcast %cst_16 : f32 to vector<32x128xf32>
    %29 = arith.maximumf %27, %28 : vector<32x128xf32>
    %c2 = arith.constant 2 : index
    %c0_17 = arith.constant 0 : index
    %30 = vector.load %arg5[%c2, %c0_17] : memref<12x128xf32, #tpu.memory_space<vmem>>, vector<1x128xf32>
    %31 = vector.shape_cast %30 : vector<1x128xf32> to vector<128xf32>
    %32 = vector.shape_cast %31 : vector<128xf32> to vector<1x128xf32>
    %33 = vector.broadcast %32 : vector<1x128xf32> to vector<32x128xf32>
    %34 = arith.mulf %29, %33 : vector<32x128xf32>
    %c3 = arith.constant 3 : index
    %c0_18 = arith.constant 0 : index
    %35 = vector.load %arg5[%c3, %c0_18] : memref<12x128xf32, #tpu.memory_space<vmem>>, vector<1x128xf32>
    %36 = vector.shape_cast %35 : vector<1x128xf32> to vector<128xf32>
    %37 = vector.shape_cast %36 : vector<128xf32> to vector<1x128xf32>
    %38 = vector.broadcast %37 : vector<1x128xf32> to vector<32x128xf32>
    %39 = arith.addf %34, %38 : vector<32x128xf32>
    %c0_19 = arith.constant 0 : index
    %c0_20 = arith.constant 0 : index
    %40 = vector.load %arg2[%c0_19, %c0_20] : memref<32x32xbf16, #tpu.memory_space<vmem>>, vector<32x32xbf16>
    %41 = arith.truncf %39 : vector<32x128xf32> to vector<32x128xbf16>
    %cst_21 = arith.constant dense<0.000000e+00> : vector<32x128xf32>
    %42 = tpu.matmul %40, %41, %cst_21 {dimension_numbers = #tpu.dot_dimension_numbers<[1], [0], [0], [1], [0, 0, 1, 1], [], []>} : vector<32x32xbf16>, vector<32x128xbf16>, vector<32x128xf32> -> vector<32x128xf32>
    %c1_22 = arith.constant 1 : index
    %43 = memref.load %arg0[%c1_22] : memref<3xf32, #tpu.memory_space<smem>>
    %44 = vector.broadcast %43 : f32 to vector<32x128xf32>
    %45 = arith.mulf %44, %39 : vector<32x128xf32>
    %46 = arith.addf %45, %42 : vector<32x128xf32>
    %47 = arith.truncf %46 : vector<32x128xf32> to vector<32x128xbf16>
    %c2_23 = arith.constant 2 : index
    %c0_24 = arith.constant 0 : index
    %c0_25 = arith.constant 0 : index
    %48 = vector.load %arg4[%c2_23, %c0_24, %c0_25] : memref<6x128x128xbf16, #tpu.memory_space<vmem>>, vector<1x128x128xbf16>
    %49 = vector.shape_cast %48 : vector<1x128x128xbf16> to vector<128x128xbf16>
    %cst_26 = arith.constant dense<0.000000e+00> : vector<32x128xf32>
    %50 = tpu.matmul %47, %49, %cst_26 {dimension_numbers = #tpu.dot_dimension_numbers<[1], [0], [0], [1], [0, 0, 1, 1], [], []>} : vector<32x128xbf16>, vector<128x128xbf16>, vector<32x128xf32> -> vector<32x128xf32>
    %c4 = arith.constant 4 : index
    %c0_27 = arith.constant 0 : index
    %51 = vector.load %arg5[%c4, %c0_27] : memref<12x128xf32, #tpu.memory_space<vmem>>, vector<1x128xf32>
    %52 = vector.shape_cast %51 : vector<1x128xf32> to vector<128xf32>
    %53 = vector.shape_cast %52 : vector<128xf32> to vector<1x128xf32>
    %54 = vector.broadcast %53 : vector<1x128xf32> to vector<32x128xf32>
    %55 = arith.addf %50, %54 : vector<32x128xf32>
    %cst_28 = arith.constant 0.000000e+00 : f32
    %56 = vector.broadcast %cst_28 : f32 to vector<32x128xf32>
    %57 = arith.maximumf %55, %56 : vector<32x128xf32>
    %58 = arith.truncf %57 : vector<32x128xf32> to vector<32x128xbf16>
    %c3_29 = arith.constant 3 : index
    %c0_30 = arith.constant 0 : index
    %c0_31 = arith.constant 0 : index
    %59 = vector.load %arg4[%c3_29, %c0_30, %c0_31] : memref<6x128x128xbf16, #tpu.memory_space<vmem>>, vector<1x128x128xbf16>
    %60 = vector.shape_cast %59 : vector<1x128x128xbf16> to vector<128x128xbf16>
    %cst_32 = arith.constant dense<0.000000e+00> : vector<32x128xf32>
    %61 = tpu.matmul %58, %60, %cst_32 {dimension_numbers = #tpu.dot_dimension_numbers<[1], [0], [0], [1], [0, 0, 1, 1], [], []>} : vector<32x128xbf16>, vector<128x128xbf16>, vector<32x128xf32> -> vector<32x128xf32>
    %c5 = arith.constant 5 : index
    %c0_33 = arith.constant 0 : index
    %62 = vector.load %arg5[%c5, %c0_33] : memref<12x128xf32, #tpu.memory_space<vmem>>, vector<1x128xf32>
    %63 = vector.shape_cast %62 : vector<1x128xf32> to vector<128xf32>
    %64 = vector.shape_cast %63 : vector<128xf32> to vector<1x128xf32>
    %65 = vector.broadcast %64 : vector<1x128xf32> to vector<32x128xf32>
    %66 = arith.addf %61, %65 : vector<32x128xf32>
    %cst_34 = arith.constant 0.000000e+00 : f32
    %67 = vector.broadcast %cst_34 : f32 to vector<32x128xf32>
    %68 = arith.maximumf %66, %67 : vector<32x128xf32>
    %c6 = arith.constant 6 : index
    %c0_35 = arith.constant 0 : index
    %69 = vector.load %arg5[%c6, %c0_35] : memref<12x128xf32, #tpu.memory_space<vmem>>, vector<1x128xf32>
    %70 = vector.shape_cast %69 : vector<1x128xf32> to vector<128xf32>
    %71 = vector.shape_cast %70 : vector<128xf32> to vector<1x128xf32>
    %72 = vector.broadcast %71 : vector<1x128xf32> to vector<32x128xf32>
    %73 = arith.mulf %68, %72 : vector<32x128xf32>
    %c7 = arith.constant 7 : index
    %c0_36 = arith.constant 0 : index
    %74 = vector.load %arg5[%c7, %c0_36] : memref<12x128xf32, #tpu.memory_space<vmem>>, vector<1x128xf32>
    %75 = vector.shape_cast %74 : vector<1x128xf32> to vector<128xf32>
    %76 = vector.shape_cast %75 : vector<128xf32> to vector<1x128xf32>
    %77 = vector.broadcast %76 : vector<1x128xf32> to vector<32x128xf32>
    %78 = arith.addf %73, %77 : vector<32x128xf32>
    %c0_37 = arith.constant 0 : index
    %c0_38 = arith.constant 0 : index
    %79 = vector.load %arg2[%c0_37, %c0_38] : memref<32x32xbf16, #tpu.memory_space<vmem>>, vector<32x32xbf16>
    %80 = arith.truncf %78 : vector<32x128xf32> to vector<32x128xbf16>
    %cst_39 = arith.constant dense<0.000000e+00> : vector<32x128xf32>
    %81 = tpu.matmul %79, %80, %cst_39 {dimension_numbers = #tpu.dot_dimension_numbers<[1], [0], [0], [1], [0, 0, 1, 1], [], []>} : vector<32x32xbf16>, vector<32x128xbf16>, vector<32x128xf32> -> vector<32x128xf32>
    %c2_40 = arith.constant 2 : index
    %82 = memref.load %arg0[%c2_40] : memref<3xf32, #tpu.memory_space<smem>>
    %83 = vector.broadcast %82 : f32 to vector<32x128xf32>
    %84 = arith.mulf %83, %78 : vector<32x128xf32>
    %85 = arith.addf %84, %81 : vector<32x128xf32>
    %86 = arith.truncf %85 : vector<32x128xf32> to vector<32x128xbf16>
    %c4_41 = arith.constant 4 : index
    %c0_42 = arith.constant 0 : index
    %c0_43 = arith.constant 0 : index
    %87 = vector.load %arg4[%c4_41, %c0_42, %c0_43] : memref<6x128x128xbf16, #tpu.memory_space<vmem>>, vector<1x128x128xbf16>
    %88 = vector.shape_cast %87 : vector<1x128x128xbf16> to vector<128x128xbf16>
    %cst_44 = arith.constant dense<0.000000e+00> : vector<32x128xf32>
    %89 = tpu.matmul %86, %88, %cst_44 {dimension_numbers = #tpu.dot_dimension_numbers<[1], [0], [0], [1], [0, 0, 1, 1], [], []>} : vector<32x128xbf16>, vector<128x128xbf16>, vector<32x128xf32> -> vector<32x128xf32>
    %c8 = arith.constant 8 : index
    %c0_45 = arith.constant 0 : index
    %90 = vector.load %arg5[%c8, %c0_45] : memref<12x128xf32, #tpu.memory_space<vmem>>, vector<1x128xf32>
    %91 = vector.shape_cast %90 : vector<1x128xf32> to vector<128xf32>
    %92 = vector.shape_cast %91 : vector<128xf32> to vector<1x128xf32>
    %93 = vector.broadcast %92 : vector<1x128xf32> to vector<32x128xf32>
    %94 = arith.addf %89, %93 : vector<32x128xf32>
    %cst_46 = arith.constant 0.000000e+00 : f32
    %95 = vector.broadcast %cst_46 : f32 to vector<32x128xf32>
    %96 = arith.maximumf %94, %95 : vector<32x128xf32>
    %97 = arith.truncf %96 : vector<32x128xf32> to vector<32x128xbf16>
    %c5_47 = arith.constant 5 : index
    %c0_48 = arith.constant 0 : index
    %c0_49 = arith.constant 0 : index
    %98 = vector.load %arg4[%c5_47, %c0_48, %c0_49] : memref<6x128x128xbf16, #tpu.memory_space<vmem>>, vector<1x128x128xbf16>
    %99 = vector.shape_cast %98 : vector<1x128x128xbf16> to vector<128x128xbf16>
    %cst_50 = arith.constant dense<0.000000e+00> : vector<32x128xf32>
    %100 = tpu.matmul %97, %99, %cst_50 {dimension_numbers = #tpu.dot_dimension_numbers<[1], [0], [0], [1], [0, 0, 1, 1], [], []>} : vector<32x128xbf16>, vector<128x128xbf16>, vector<32x128xf32> -> vector<32x128xf32>
    %c9 = arith.constant 9 : index
    %c0_51 = arith.constant 0 : index
    %101 = vector.load %arg5[%c9, %c0_51] : memref<12x128xf32, #tpu.memory_space<vmem>>, vector<1x128xf32>
    %102 = vector.shape_cast %101 : vector<1x128xf32> to vector<128xf32>
    %103 = vector.shape_cast %102 : vector<128xf32> to vector<1x128xf32>
    %104 = vector.broadcast %103 : vector<1x128xf32> to vector<32x128xf32>
    %105 = arith.addf %100, %104 : vector<32x128xf32>
    %cst_52 = arith.constant 0.000000e+00 : f32
    %106 = vector.broadcast %cst_52 : f32 to vector<32x128xf32>
    %107 = arith.maximumf %105, %106 : vector<32x128xf32>
    %c10 = arith.constant 10 : index
    %c0_53 = arith.constant 0 : index
    %108 = vector.load %arg5[%c10, %c0_53] : memref<12x128xf32, #tpu.memory_space<vmem>>, vector<1x128xf32>
    %109 = vector.shape_cast %108 : vector<1x128xf32> to vector<128xf32>
    %110 = vector.shape_cast %109 : vector<128xf32> to vector<1x128xf32>
    %111 = vector.broadcast %110 : vector<1x128xf32> to vector<32x128xf32>
    %112 = arith.mulf %107, %111 : vector<32x128xf32>
    %c11 = arith.constant 11 : index
    %c0_54 = arith.constant 0 : index
    %113 = vector.load %arg5[%c11, %c0_54] : memref<12x128xf32, #tpu.memory_space<vmem>>, vector<1x128xf32>
    %114 = vector.shape_cast %113 : vector<1x128xf32> to vector<128xf32>
    %115 = vector.shape_cast %114 : vector<128xf32> to vector<1x128xf32>
    %116 = vector.broadcast %115 : vector<1x128xf32> to vector<32x128xf32>
    %117 = arith.addf %112, %116 : vector<32x128xf32>
    %c0_55 = arith.constant 0 : index
    %c0_56 = arith.constant 0 : index
    %118 = vector.load %arg3[%c0_55, %c0_56] : memref<8x32xbf16, #tpu.memory_space<vmem>>, vector<8x32xbf16>
    %119 = arith.truncf %117 : vector<32x128xf32> to vector<32x128xbf16>
    %cst_57 = arith.constant dense<0.000000e+00> : vector<8x128xf32>
    %120 = tpu.matmul %118, %119, %cst_57 {dimension_numbers = #tpu.dot_dimension_numbers<[1], [0], [0], [1], [0, 0, 1, 1], [], []>} : vector<8x32xbf16>, vector<32x128xbf16>, vector<8x128xf32> -> vector<8x128xf32>
    %121 = arith.truncf %120 : vector<8x128xf32> to vector<8x128xbf16>
    %c0_58 = arith.constant 0 : index
    %c0_59 = arith.constant 0 : index
    %122 = vector.load %arg6[%c0_58, %c0_59] : memref<128x128xbf16, #tpu.memory_space<vmem>>, vector<128x128xbf16>
    %cst_60 = arith.constant dense<0.000000e+00> : vector<8x128xf32>
    %123 = tpu.matmul %121, %122, %cst_60 {dimension_numbers = #tpu.dot_dimension_numbers<[1], [0], [0], [1], [0, 0, 1, 1], [], []>} : vector<8x128xbf16>, vector<128x128xbf16>, vector<8x128xf32> -> vector<8x128xf32>
    %c0_61 = arith.constant 0 : index
    %c0_62 = arith.constant 0 : index
    %124 = vector.load %arg8[%c0_61, %c0_62] : memref<2x128xf32, #tpu.memory_space<vmem>>, vector<1x128xf32>
    %125 = vector.shape_cast %124 : vector<1x128xf32> to vector<128xf32>
    %126 = vector.shape_cast %125 : vector<128xf32> to vector<1x128xf32>
    %127 = vector.broadcast %126 : vector<1x128xf32> to vector<8x128xf32>
    %128 = arith.addf %123, %127 : vector<8x128xf32>
    %cst_63 = arith.constant 0.000000e+00 : f32
    %129 = vector.broadcast %cst_63 : f32 to vector<8x128xf32>
    %130 = arith.maximumf %128, %129 : vector<8x128xf32>
    %131 = arith.truncf %130 : vector<8x128xf32> to vector<8x128xbf16>
    %c0_64 = arith.constant 0 : index
    %c0_65 = arith.constant 0 : index
    %132 = vector.load %arg7[%c0_64, %c0_65] : memref<128x128xbf16, #tpu.memory_space<vmem>>, vector<128x128xbf16>
    %cst_66 = arith.constant dense<0.000000e+00> : vector<8x128xf32>
    %133 = tpu.matmul %131, %132, %cst_66 {dimension_numbers = #tpu.dot_dimension_numbers<[1], [0], [0], [1], [0, 0, 1, 1], [], []>} : vector<8x128xbf16>, vector<128x128xbf16>, vector<8x128xf32> -> vector<8x128xf32>
    %c1_67 = arith.constant 1 : index
    %c0_68 = arith.constant 0 : index
    %134 = vector.load %arg8[%c1_67, %c0_68] : memref<2x128xf32, #tpu.memory_space<vmem>>, vector<1x128xf32>
    %135 = vector.shape_cast %134 : vector<1x128xf32> to vector<128xf32>
    %136 = vector.shape_cast %135 : vector<128xf32> to vector<1x128xf32>
    %137 = vector.broadcast %136 : vector<1x128xf32> to vector<8x128xf32>
    %138 = arith.addf %133, %137 : vector<8x128xf32>
    %cst_69 = arith.constant dense<0xFF800000> : vector<8xf32>
    %139 = vector.multi_reduction <maximumf>, %138, %cst_69 [1] : vector<8x128xf32> to vector<8xf32>
    %140 = vector.shape_cast %139 : vector<8xf32> to vector<8x1xf32>
    %141 = vector.broadcast %140 : vector<8x1xf32> to vector<8x128xf32>
    %142 = arith.subf %138, %141 : vector<8x128xf32>
    %143 = math.exp %142 : vector<8x128xf32>
    %cst_70 = arith.constant dense<0.000000e+00> : vector<8xf32>
    %144 = vector.multi_reduction <add>, %143, %cst_70 [1] : vector<8x128xf32> to vector<8xf32>
    %145 = vector.shape_cast %144 : vector<8xf32> to vector<8x1xf32>
    %146 = math.log %145 : vector<8x1xf32>
    %147 = arith.addf %146, %140 : vector<8x1xf32>
    %148 = vector.broadcast %147 : vector<8x1xf32> to vector<8x128xf32>
    %149 = arith.subf %138, %148 : vector<8x128xf32>
    %c0_71 = arith.constant 0 : index
    %c0_72 = arith.constant 0 : index
    %150 = vector.load %arg9[%c0_71, %c0_72] : memref<8x128xf32, #tpu.memory_space<vmem>>, vector<8x128xf32>
    tpu.vector_store %arg9[%c0_71, %c0_72], %149 {strides = array<i32>} : memref<8x128xf32, #tpu.memory_space<vmem>>, vector<8x128xf32>,
    return
  }
}

</mosaic_0001>

<bundles_post_ra>
// kernel: gin_forward.1
= control target key start
LH: loop header
LB: loop body
LE: loop exit
PB: predicated region body
PF: predicated region fallthrough
CT: control target
= control target key end

     0   :  { %14 = vsyncpa [#allocation5], 0  ;;  %s2330_s0 = inlined_call_operand.hbm [shape: f32[3], index: 0, kind: input, shape index: {}]   ;;  %s2331_s1 = inlined_call_operand.hbm [shape: f32[32,128], index: 1, kind: input, shape index: {}]   ;;  %s2332_s2 = inlined_call_operand.hbm [shape: bf16[32,32], index: 2, kind: input, shape index: {}]   ;;  %s2333_s3 = inlined_call_operand.hbm [shape: bf16[8,32], index: 3, kind: input, shape index: {}]   ;;  %s2334_s4 = inlined_call_operand.hbm [shape: bf16[6,128,128], index: 4, kind: input, shape index: {}]   ;;  %s2335_s5 = inlined_call_operand.vmem [shape: f32[12,128], index: 5, kind: input, shape index: {}]   ;;  %s2336_s6 = inlined_call_operand.hbm [shape: bf16[128,128], index: 6, kind: input, shape index: {}]   ;;  %s2337_s7 = inlined_call_operand.hbm [shape: bf16[128,128], index: 7, kind: input, shape index: {}]   ;;  %s2338_s8 = inlined_call_operand.vmem [shape: f32[2,128], index: 8, kind: input, shape index: {}]   ;;  %s2339_s9 = inlined_call_operand.hbm [shape: f32[8,128], index: 9, kind: output, shape index: {}]  }
   0x1   :  { %15 = vsyncpa [#allocation3], 0 }
   0x2   :  { %16 = vsyncpa [#allocation8], 0 }
   0x3   :  { %17 = vsyncpa [#allocation11], 0 }
   0x4   :  { %18 = vsyncpa [#allocation14], 0 }
   0x5   :  { %19 = vsyncpa [#allocation4], 0  ;;  %s2068_s30 = smov [#allocation7]   ;;  %s1892_s13 = scalar_lea.hbm %s2332_s2, 256 }
   0x6   :  { %s45_s10 = sshll.u32 %s2068_s30, 4  ;;  %p1893_p0 = scmp.ne.s32.totalorder %s2332_s2, %s1892_s13  ;;  %s46_s10 = int_to_ptr.vmem [resolvable:$true] %s45_s10 }
   0x7   :  { %p1896_p1 = scmp.lt.u32.totalorder %s1892_s13, %s2332_s2 }
   0x9   :  { %p1898_p2 = pnand %p1896_p1, %p1893_p0 }
   0xb   :  { %1901 = shalt.err (!%p1898_p2)
}
   0xc   :  { %s1902_s18 = scalar_lea.vmem %s46_s10, 256  ;;  %p1907_p4 = scmp.lt.s32.totalorder %s46_s10, %s46_s10 }
   0xd   :  { %p1903_p3 = scmp.ne.s32.totalorder %s46_s10, %s1902_s18  ;;  %p1908_p5 = scmp.lt.s32.totalorder %s1902_s18, %s1902_s18 }
   0xf   :  { %p1909_p6 = por %p1908_p5, %p1907_p4 }
  0x11   :  { %p1910_p7 = pnand %p1909_p6, %p1903_p3 }
  0x13   :  { %1913 = shalt.err (!%p1910_p7)
}
  0x14   :  { %s2069_s19 = smov 64   ;;  %s2070_s20 = smov 4  }
  0x15   :  { %51 = dma.hbm_to_vmem [thread:$0]  %s2332_s2, 256, %s46_s10, [#allocation8], %s2069_s19, %s2069_s19, %s2070_s20  }
  0x16   :  { %s2071_s23 = smov [#allocation10]   ;;  %s1914_s27 = scalar_lea.hbm %s2334_s4, 6144 }
  0x17   :  { %s67_s24 = sshll.u32 %s2071_s23, 4  ;;  %p1915_p8 = scmp.ne.s32.totalorder %s2334_s4, %s1914_s27  ;;  %s68_s24 = int_to_ptr.vmem [resolvable:$true] %s67_s24 }
  0x18   :  { %p1918_p9 = scmp.lt.u32.totalorder %s1914_s27, %s2334_s4 }
  0x1a   :  { %p1920_p10 = pnand %p1918_p9, %p1915_p8 }
  0x1c   :  { %1923 = shalt.err (!%p1920_p10)
}
  0x1d   :  { %s1924_s12 = scalar_lea.vmem %s68_s24, 6144  ;;  %p1929_p12 = scmp.lt.s32.totalorder %s68_s24, %s68_s24 }
  0x1e   :  { %p1925_p11 = scmp.ne.s32.totalorder %s68_s24, %s1924_s12  ;;  %p1930_p13 = scmp.lt.s32.totalorder %s1924_s12, %s1924_s12 }
  0x20   :  { %p1931_p0 = por %p1930_p13, %p1929_p12 }
  0x22   :  { %p1932_p1 = pnand %p1931_p0, %p1925_p11 }
  0x24   :  { %1935 = shalt.err (!%p1932_p1)
}
  0x25   :  { %73 = dma.hbm_to_vmem [thread:$0]  %s2334_s4, 6144, %s68_s24, [#allocation11], %s2069_s19, %s2069_s19, %s2070_s20  }
  0x26   :  { %s1936_s15 = scalar_lea.hbm %s2330_s0, 16 }
  0x27   :  { %p1937_p2 = scmp.ne.s32.totalorder %s2330_s0, %s1936_s15  ;;  %p1940_p3 = scmp.lt.u32.totalorder %s1936_s15, %s2330_s0 }
  0x29   :  { %p1942_p4 = pnand %p1940_p3, %p1937_p2 }
  0x2b   :  { %1945 = shalt.err (!%p1942_p4)
}
  0x2c   :  { %s2072_s22 = smov [#allocation2]   ;;  %s2073_s4 = smov [#allocation6]  }
  0x2d   :  { %27 = dma.hbm_to_smem %s2330_s0, 16, %s2072_s22, [#allocation5]  }
  0x2e   :  { %s33_s24 = sshll.u32 %s2073_s4, 4  ;;  %s1946_s28 = scalar_lea.hbm %s2331_s1, 512  ;;  %s34_s24 = int_to_ptr.vmem [resolvable:$true] %s33_s24 }
  0x2f   :  { %p1947_p5 = scmp.ne.s32.totalorder %s2331_s1, %s1946_s28  ;;  %p1950_p6 = scmp.lt.u32.totalorder %s1946_s28, %s2331_s1 }
  0x31   :  { %p1952_p7 = pnand %p1950_p6, %p1947_p5 }
  0x33   :  { %1955 = shalt.err (!%p1952_p7)
}
  0x34   :  { %s1956_s2 = scalar_lea.vmem %s34_s24, 512  ;;  %p1961_p9 = scmp.lt.s32.totalorder %s34_s24, %s34_s24 }
  0x35   :  { %p1957_p8 = scmp.ne.s32.totalorder %s34_s24, %s1956_s2  ;;  %p1962_p10 = scmp.lt.s32.totalorder %s1956_s2, %s1956_s2 }
  0x37   :  { %p1963_p11 = por %p1962_p10, %p1961_p9 }
  0x39   :  { %p1964_p12 = pnand %p1963_p11, %p1957_p8 }
  0x3b   :  { %1967 = shalt.err (!%p1964_p12)
}
  0x3c   :  { %s2074_s0 = smov 128   ;;  %s2075_s10 = smov 8  }
  0x3d   :  { %39 = dma.hbm_to_vmem [thread:$0]  %s2331_s1, 512, %s34_s24, [#allocation3], %s2074_s0, %s2074_s0, %s2075_s10  }
  0x3e   :  { %s2076_s15 = smov [#allocation9]   ;;  %s2077_s17 = smov [#allocation12]  }
  0x3f   :  { %s58_s16 = sshll.u32 %s2076_s15, 4  ;;  %s81_s18 = sshll.u32 %s2077_s17, 4  ;;  %s59_s16 = int_to_ptr.vmem [resolvable:$true] %s58_s16  ;;  %s2186_s18 = int_to_ptr.vmem [resolvable:$true] %s81_s18 }
  0x40   :  { %s1968_s23 = scalar_lea.hbm %s2333_s3, 64 }
  0x41   :  { %p1969_p13 = scmp.ne.s32.totalorder %s2333_s3, %s1968_s23  ;;  %p1972_p0 = scmp.lt.u32.totalorder %s1968_s23, %s2333_s3 }
  0x43   :  { %p1974_p1 = pnand %p1972_p0, %p1969_p13 }
  0x45   :  { %1977 = shalt.err (!%p1974_p1)
}
  0x46   :  { %s1978_s1 = scalar_lea.vmem %s59_s16, 64  ;;  %p1983_p3 = scmp.lt.s32.totalorder %s59_s16, %s59_s16 }
  0x47   :  { %p1979_p2 = scmp.ne.s32.totalorder %s59_s16, %s1978_s1  ;;  %p1984_p4 = scmp.lt.s32.totalorder %s1978_s1, %s1978_s1 }
  0x49   :  { %p1985_p5 = por %p1984_p4, %p1983_p3 }
  0x4b   :  { %p1986_p6 = pnand %p1985_p5, %p1979_p2 }
  0x4d   :  { %1989 = shalt.err (!%p1986_p6)
}
  0x4e   :  { %61 = dma.hbm_to_vmem [thread:$0]  %s2333_s3, 64, %s59_s16, [#allocation8]  }
  0x4f   :  { %s1990_s11 = scalar_lea.hbm %s2336_s6, 1024 }
  0x50   :  { %p1991_p7 = scmp.ne.s32.totalorder %s2336_s6, %s1990_s11  ;;  %p1994_p8 = scmp.lt.u32.totalorder %s1990_s11, %s2336_s6 }
  0x52   :  { %p1996_p9 = pnand %p1994_p8, %p1991_p7 }
  0x54   :  { %1999 = shalt.err (!%p1996_p9)
}
  0x55   :  { %s2000_s13 = scalar_lea.vmem %s2186_s18, 1024  ;;  %p2005_p11 = scmp.lt.s32.totalorder %s2186_s18, %s2186_s18 }
  0x56   :  { %p2001_p10 = scmp.ne.s32.totalorder %s2186_s18, %s2000_s13  ;;  %p2006_p12 = scmp.lt.s32.totalorder %s2000_s13, %s2000_s13 }
  0x58   :  { %p2007_p13 = por %p2006_p12, %p2005_p11 }
  0x5a   :  { %p2008_p0 = pnand %p2007_p13, %p2001_p10 }
  0x5c   :  { %2011 = shalt.err (!%p2008_p0)
}
  0x5d   :  { %87 = dma.hbm_to_vmem [thread:$0]  %s2336_s6, 1024, %s2186_s18, [#allocation11], %s2069_s19, %s2069_s19, %s2070_s20  }
  0x5e   :  { %s2078_s15 = smov [#allocation13]   ;;  %s2012_s22 = scalar_lea.hbm %s2337_s7, 1024 }
  0x5f   :  { %s93_s16 = sshll.u32 %s2078_s15, 4  ;;  %p2013_p1 = scmp.ne.s32.totalorder %s2337_s7, %s2012_s22  ;;  %s94_s16 = int_to_ptr.vmem [resolvable:$true] %s93_s16 }
  0x60   :  { %p2016_p2 = scmp.lt.u32.totalorder %s2012_s22, %s2337_s7 }
  0x62   :  { %p2018_p3 = pnand %p2016_p2, %p2013_p1 }
  0x64   :  { %2021 = shalt.err (!%p2018_p3)
}
  0x65   :  { %s2022_s27 = scalar_lea.vmem %s94_s16, 1024  ;;  %p2027_p5 = scmp.lt.s32.totalorder %s94_s16, %s94_s16 }
  0x66   :  { %p2023_p4 = scmp.ne.s32.totalorder %s94_s16, %s2022_s27  ;;  %p2028_p6 = scmp.lt.s32.totalorder %s2022_s27, %s2022_s27 }
  0x68   :  { %p2029_p7 = por %p2028_p6, %p2027_p5 }
  0x6a   :  { %p2030_p8 = pnand %p2029_p7, %p2023_p4 }
  0x6c   :  { %2033 = shalt.err (!%p2030_p8)
}
  0x6d   :  { %99 = dma.hbm_to_vmem [thread:$0]  %s2337_s7, 1024, %s94_s16, [#allocation14], %s2069_s19, %s2069_s19, %s2070_s20  }
  0x6e   :  { %2056 = dma.done.wait [#allocation5], 16  }
  0x6f   :  { %2057 = vsyncadd [#allocation5], 4294967280 }
  0x70   :  { %2058 = dma.done.wait [#allocation3], 512  }
  0x71   :  { %2059 = vsyncadd [#allocation3], 4294966784 }
  0x72   :  { %2060 = dma.done.wait [#allocation8], 320  }
  0x73   :  { %2061 = vsyncadd [#allocation8], 4294966976 }
  0x74   :  { %2062 = dma.done.wait [#allocation11], 7168  }
  0x75   :  { %2063 = vsyncadd [#allocation11], 4294960128 }
  0x76   :  { %2064 = dma.done.wait [#allocation14], 1024  }
  0x77   :  { %2065 = vsyncadd [#allocation14], 4294966272 }
  0x78   :  { %123 = sfence }
  0x79   :  { %v125_v0 = vld [vmem:[#allocation6] sm:$0xff]  ;;  %v126_v1 = vld [vmem:[#allocation6 + $0x8] sm:$0xff]  ;;  %v127_v2 = vld [vmem:[#allocation6 + $0x10] sm:$0xff]  ;;  %vm145_vm0 = vcmask 261120   ;;  %s201_s7 = sld [smem:[#allocation2]]  ;;  %s1460_s12 = sld [smem:[#allocation2 + $0x1]] }
  0x7a   :  { %v133_v3 = vpack.c.bf16 %v126_v1, %v125_v0  ;;  %v128_v4 = vld [vmem:[#allocation6 + $0x18] sm:$0xff]  ;;  %v2235_v6 = vld [vmem:[#allocation7] sm:$0xff]   ;;  %v2239_v9 = vld [vmem:[#allocation7 + $0x8] sm:$0xff]   ;;  %s1483_s17 = sld [smem:[#allocation2 + $0x2]]  ;;  %vm2080_vm1 = vmmov 0   ;;  %s2081_s20 = smov [#allocation15]  }
  0x7b   :  { %v134_v5 = vpack.c.bf16 %v128_v4, %v127_v2  ;;  %1620 = vmatprep.mubr.msk.bf16.mxu0 %vm145_vm0, %v2235_v6  ;;  %v1824_v7 = vld [vmem:[#allocation10] sm:$0xff]   ;;  %v1825_v8 = vld [vmem:[#allocation10 + $0x8] sm:$0xff]   ;;  %v1826_v10 = vld [vmem:[#allocation10 + $0x10] sm:$0xff]   ;;  %s1421_s1 = sshll.u32 %s2081_s20, 4  ;;  %s1422_s1 = int_to_ptr.vmem [resolvable:$true] %s1421_s1 }
  0x7c   :  { %1616 = vmatprep.subr.bf16.mxu0 %v133_v3  ;;  %1624 = vmatprep.subr.bf16.mxu1 %v1824_v7  ;;  %v1827_v11 = vld [vmem:[#allocation10 + $0x18] sm:$0xff]   ;;  %v1828_v12 = vld [vmem:[#allocation10 + $0x20] sm:$0xff]   ;;  %v1829_v13 = vld [vmem:[#allocation10 + $0x28] sm:$0xff]   ;;  %p2039_p10 = scmp.lt.s32.totalorder %s1422_s1, %s1422_s1 }
  0x7d   :  { %1617 = vmatpush3.bf16.msra.mxu0 %v133_v3  ;;  %1625 = vmatpush3.bf16.msra.mxu1 %v1824_v7  ;;  %v1830_v14 = vld [vmem:[#allocation10 + $0x30] sm:$0xff]   ;;  %v1831_v15 = vld [vmem:[#allocation10 + $0x38] sm:$0xff]   ;;  %v1832_v16 = vld [vmem:[#allocation10 + $0x40] sm:$0xff]  }
  0x7e   :  { %1618 = vmatprep.subr.bf16.mxu0 %v134_v5  ;;  %1626 = vmatprep.subr.bf16.mxu1 %v1825_v8  ;;  %v1833_v17 = vld [vmem:[#allocation10 + $0x48] sm:$0xff]   ;;  %v1834_v18 = vld [vmem:[#allocation10 + $0x50] sm:$0xff]   ;;  %v1835_v19 = vld [vmem:[#allocation10 + $0x58] sm:$0xff]  }
  0x7f   :  { %v1836_v20 = vld [vmem:[#allocation10 + $0x60] sm:$0xff]   ;;  %v1837_v21 = vld [vmem:[#allocation10 + $0x68] sm:$0xff]   ;;  %v202_v22 = vstv %s201_s7  ;;  %v1838_v37 = vld [vmem:[#allocation10 + $0x70] sm:$0xff]  }
  0x80   :  { %v205_v23 = vmul.f32 %v202_v22, %v127_v2  ;;  %v206_v24 = vmul.f32 %v202_v22, %v128_v4  ;;  %v203_v26 = vmul.f32 %v202_v22, %v125_v0  ;;  %v204_v27 = vmul.f32 %v202_v22, %v126_v1  ;;  %v1839_v38 = vld [vmem:[#allocation10 + $0x78] sm:$0xff]   ;;  %v1438_v39 = vld [vmem:[%s2335_s5] ss:$0 sm:$0xff]  ;;  %v1840_v54 = vld [vmem:[#allocation10 + $0x80] sm:$0xff]  }
  0x81   :  { %1619 = vmatpush3.bf16.msra.mxu0 %v134_v5  ;;  %1627 = vmatpush3.bf16.msra.mxu1 %v1825_v8  ;;  %v1841_v55 = vld [vmem:[#allocation10 + $0x88] sm:$0xff]   ;;  %v1842_v56 = vld [vmem:[#allocation10 + $0x90] sm:$0xff]   ;;  %v1843_v57 = vld [vmem:[#allocation10 + $0x98] sm:$0xff]  }
  0x82   :  { %1628 = vmatprep.subr.bf16.mxu1 %v1826_v10  ;;  %1644 = vmatprep.subr.bf16.mxu0 %v1832_v16  ;;  %v1844_v58 = vld [vmem:[#allocation10 + $0xa0] sm:$0xff]   ;;  %v1845_v59 = vld [vmem:[#allocation10 + $0xa8] sm:$0xff]   ;;  %v1447_v60 = vld [vmem:[%s2335_s5 + $0x1] ss:$0 sm:$0xff] }
  0x83   :  { %v1456_v0 = vld [vmem:[%s2335_s5 + $0x2] ss:$0 sm:$0xff] }
  0x84   :  { %1621 = vmatmul.mubr.msk.bf16.vlgmr.msra.gmra.mrb[0].mxu0 %vm145_vm0, %v2239_v9 }
  0x85   :  { %1629 = vmatpush3.bf16.msra.mxu1 %v1826_v10  ;;  %1645 = vmatpush3.bf16.msra.mxu0 %v1832_v16 }
  0x86   :  { %1630 = vmatprep.subr.bf16.mxu1 %v1827_v11  ;;  %1646 = vmatprep.subr.bf16.mxu0 %v1833_v17 }
  0x89   :  { %1631 = vmatpush3.bf16.msra.mxu1 %v1827_v11  ;;  %1647 = vmatpush3.bf16.msra.mxu0 %v1833_v17 }
  0x8a   :  { %1632 = vmatprep.subr.bf16.mxu1 %v1828_v12  ;;  %1648 = vmatprep.subr.bf16.mxu0 %v1834_v18 }
  0x8d   :  { %1633 = vmatpush3.bf16.msra.mxu1 %v1828_v12  ;;  %1649 = vmatpush3.bf16.msra.mxu0 %v1834_v18  ;;  %v1457_v12 = vld [vmem:[%s2335_s5 + $0x3] ss:$0 sm:$0xff] }
  0x8e   :  { %1634 = vmatprep.subr.bf16.mxu1 %v1829_v13  ;;  %1650 = vmatprep.subr.bf16.mxu0 %v1835_v19 }
  0x91   :  { %1635 = vmatpush3.bf16.msra.mxu1 %v1829_v13  ;;  %1651 = vmatpush3.bf16.msra.mxu0 %v1835_v19 }
  0x92   :  { %1636 = vmatprep.subr.bf16.mxu1 %v1830_v14  ;;  %1652 = vmatprep.subr.bf16.mxu0 %v1836_v20 }
  0x95   :  { %1637 = vmatpush3.bf16.msra.mxu1 %v1830_v14  ;;  %1653 = vmatpush3.bf16.msra.mxu0 %v1836_v20 }
  0x96   :  { %1638 = vmatprep.subr.bf16.mxu1 %v1831_v15  ;;  %1654 = vmatprep.subr.bf16.mxu0 %v1837_v21 }
  0x99   :  { %1639 = vmatpush3.bf16.msra.mxu1 %v1831_v15  ;;  %1655 = vmatpush3.bf16.msra.mxu0 %v1837_v21 }
  0x9a   :  { %1656 = vmatprep.subr.bf16.mxu0 %v1838_v37 }
  0x9d   :  { %1657 = vmatpush3.bf16.msra.mxu0 %v1838_v37 }
  0x9e   :  { %1658 = vmatprep.subr.bf16.mxu0 %v1839_v38 }
  0xa1   :  { %1659 = vmatpush3.bf16.msra.mxu0 %v1839_v38 }
  0xa2   :  { %1672 = vmatprep.subr.bf16.mxu0 %v1840_v54 }
 0x157   :  { %v1622_v25 = vpop.f32.mrb[0].mxu0 }
 0x158   :  { %v186_v28 = vpop.f32.mrb[1].mxu0  ;;  %v209_v30 = vadd.f32 %v1622_v25, %v205_v23  ;;  %v1846_v23 = vld [vmem:[#allocation10 + $0xb0] sm:$0xff]   ;;  %v1848_v25 = vld [vmem:[#allocation10 + $0xc0] sm:$0xff]  }
 0x159   :  { %v1623_v29 = vpop.f32.mrb[2].mxu0  ;;  %v207_v33 = vadd.f32 %v203_v26, %v186_v28  ;;  %v1849_v26 = vld [vmem:[#allocation10 + $0xc8] sm:$0xff]   ;;  %v1851_v28 = vld [vmem:[#allocation10 + $0xd8] sm:$0xff]  }
 0x15a   :  { %v210_v31 = vadd.f32 %v1623_v29, %v206_v24  ;;  %v189_v32 = vpop.f32.mrb[3].mxu0  ;;  %v1847_v24 = vld [vmem:[#allocation10 + $0xb8] sm:$0xff]   ;;  %v1852_v29 = vld [vmem:[#allocation10 + $0xe0] sm:$0xff]  }
 0x15b   :  { %v208_v34 = vadd.f32 %v204_v27, %v189_v32  ;;  %v1850_v27 = vld [vmem:[#allocation10 + $0xd0] sm:$0xff]  }
 0x15c   :  { %v212_v35 = vpack.c.bf16 %v210_v31, %v209_v30  ;;  %v1853_v30 = vld [vmem:[#allocation10 + $0xe8] sm:$0xff]   ;;  %v530_v31 = vstv %s1460_s12 }
 0x15d   :  { %v211_v36 = vpack.c.bf16 %v208_v34, %v207_v33 }
 0x15f   :  { %1640 = vmatprep.mubr.bf16.mxu1 %v211_v36 }
 0x160   :  { %1641 = vmatmul.mubr.bf16.vlgmr.msra.gmra.mrb[0].mxu1 %v212_v35 }
 0x161   :  { %1668 = vmatprep.mubr.msk.bf16.mxu1 %vm145_vm0, %v2235_v6 }
 0x233   :  { %v1642_v40 = vpop.f32.mrb[0].mxu1 }
 0x234   :  { %v325_v41 = vadd.f32 %v1642_v40, %v1438_v39  ;;  %v316_v42 = vpop.f32.mrb[1].mxu1 }
 0x235   :  { %v317_v43 = vadd.f32 %v1438_v39, %v316_v42  ;;  %v1643_v44 = vpop.f32.mrb[2].mxu1 }
 0x236   :  { %v328_v45 = vadd.f32 %v1643_v44, %v1438_v39  ;;  %v319_v46 = vpop.f32.mrb[3].mxu1  ;;  %v333_v48 = vmax.f32 %v325_v41, 0.0 }
 0x237   :  { %v320_v47 = vadd.f32 %v1438_v39, %v319_v46  ;;  %v331_v50 = vmax.f32 %v317_v43, 0.0  ;;  %v1854_v46 = vld [vmem:[#allocation10 + $0xf0] sm:$0xff]  }
 0x238   :  { %v334_v49 = vmax.f32 %v328_v45, 0.0 }
 0x239   :  { %v332_v51 = vmax.f32 %v320_v47, 0.0  ;;  %v1855_v47 = vld [vmem:[#allocation10 + $0xf8] sm:$0xff]  }
 0x23a   :  { %v336_v52 = vpack.c.bf16 %v334_v49, %v333_v48  ;;  %v1461_v48 = vld [vmem:[%s2335_s5 + $0x4] ss:$0 sm:$0xff] }
 0x23b   :  { %v335_v53 = vpack.c.bf16 %v332_v51, %v331_v50 }
 0x23d   :  { %1660 = vmatprep.mubr.bf16.mxu0 %v335_v53 }
 0x23e   :  { %1661 = vmatmul.mubr.bf16.vlgmr.msra.gmra.mrb[4].mxu0 %v336_v52 }
 0x23f   :  { %1673 = vmatpush3.bf16.msra.mxu0 %v1840_v54 }
 0x240   :  { %1674 = vmatprep.subr.bf16.mxu0 %v1841_v55 }
 0x243   :  { %1675 = vmatpush3.bf16.msra.mxu0 %v1841_v55 }
 0x244   :  { %1676 = vmatprep.subr.bf16.mxu0 %v1842_v56 }
 0x247   :  { %1677 = vmatpush3.bf16.msra.mxu0 %v1842_v56 }
 0x248   :  { %1678 = vmatprep.subr.bf16.mxu0 %v1843_v57 }
 0x24b   :  { %1679 = vmatpush3.bf16.msra.mxu0 %v1843_v57 }
 0x24c   :  { %1680 = vmatprep.subr.bf16.mxu0 %v1844_v58 }
 0x24f   :  { %1681 = vmatpush3.bf16.msra.mxu0 %v1844_v58 }
 0x250   :  { %1682 = vmatprep.subr.bf16.mxu0 %v1845_v59 }
 0x253   :  { %1683 = vmatpush3.bf16.msra.mxu0 %v1845_v59 }
 0x254   :  { %1684 = vmatprep.subr.bf16.mxu0 %v1846_v23 }
 0x257   :  { %1685 = vmatpush3.bf16.msra.mxu0 %v1846_v23 }
 0x258   :  { %1686 = vmatprep.subr.bf16.mxu0 %v1847_v24 }
 0x25b   :  { %1687 = vmatpush3.bf16.msra.mxu0 %v1847_v24 }
 0x311   :  { %v1662_v61 = vpop.f32.mrb[4].mxu0 }
 0x312   :  { %v450_v62 = vadd.f32 %v1662_v61, %v1447_v60  ;;  %v441_v63 = vpop.f32.mrb[5].mxu0 }
 0x313   :  { %v442_v1 = vadd.f32 %v1447_v60, %v441_v63  ;;  %v1663_v2 = vpop.f32.mrb[6].mxu0  ;;  %v1857_v63 = vld [vmem:[#allocation10 + $0x108] sm:$0xff]  }
 0x314   :  { %v458_v3 = vmax.f32 %v450_v62, 0.0  ;;  %v453_v4 = vadd.f32 %v1663_v2, %v1447_v60  ;;  %v444_v5 = vpop.f32.mrb[7].mxu0  ;;  %v1856_v62 = vld [vmem:[#allocation10 + $0x100] sm:$0xff]  }
 0x315   :  { %v456_v7 = vmax.f32 %v442_v1, 0.0  ;;  %v445_v8 = vadd.f32 %v1447_v60, %v444_v5  ;;  %v1859_v1 = vld [vmem:[#allocation10 + $0x118] sm:$0xff]   ;;  %v1860_v2 = vld [vmem:[#allocation10 + $0x120] sm:$0xff]  }
 0x316   :  { %v467_v10 = vmul.f32 %v1456_v0, %v458_v3  ;;  %v459_v11 = vmax.f32 %v453_v4, 0.0  ;;  %v1861_v3 = vld [vmem:[#allocation10 + $0x128] sm:$0xff]   ;;  %v1470_v4 = vld [vmem:[%s2335_s5 + $0x5] ss:$0 sm:$0xff] }
 0x317   :  { %v465_v13 = vmul.f32 %v1456_v0, %v456_v7  ;;  %v457_v14 = vmax.f32 %v445_v8, 0.0 }
 0x318   :  { %v468_v15 = vmul.f32 %v1456_v0, %v459_v11  ;;  %v476_v17 = vadd.f32 %v1457_v12, %v467_v10  ;;  %v1479_v10 = vld [vmem:[%s2335_s5 + $0x6] ss:$0 sm:$0xff] }
 0x319   :  { %v466_v16 = vmul.f32 %v1456_v0, %v457_v14  ;;  %v474_v19 = vadd.f32 %v1457_v12, %v465_v13  ;;  %v1858_v0 = vld [vmem:[#allocation10 + $0x110] sm:$0xff]  }
 0x31a   :  { %v477_v18 = vadd.f32 %v1457_v12, %v468_v15  ;;  %v533_v32 = vmul.f32 %v530_v31, %v476_v17 }
 0x31b   :  { %v475_v20 = vadd.f32 %v1457_v12, %v466_v16  ;;  %v531_v34 = vmul.f32 %v530_v31, %v474_v19 }
 0x31c   :  { %v479_v21 = vpack.c.bf16 %v477_v18, %v476_v17  ;;  %v534_v37 = vmul.f32 %v530_v31, %v477_v18 }
 0x31d   :  { %v478_v22 = vpack.c.bf16 %v475_v20, %v474_v19  ;;  %v532_v40 = vmul.f32 %v530_v31, %v475_v20  ;;  %v1480_v20 = vld [vmem:[%s2335_s5 + $0x7] ss:$0 sm:$0xff]  ;;  %v1862_v31 = vld [vmem:[#allocation10 + $0x130] sm:$0xff]  }
 0x31f   :  { %1664 = vmatprep.subr.bf16.mxu1 %v478_v22 }
 0x320   :  { %1665 = vmatpush3.bf16.msra.mxu1 %v478_v22 }
 0x321   :  { %1666 = vmatprep.subr.bf16.mxu1 %v479_v21 }
 0x324   :  { %1667 = vmatpush3.bf16.msra.mxu1 %v479_v21 }
 0x325   :  { %1692 = vmatprep.subr.bf16.mxu1 %v1848_v25 }
 0x327   :  { %1669 = vmatmul.mubr.msk.bf16.vlgmr.msra.gmra.mrb[4].mxu1 %vm145_vm0, %v2239_v9 }
 0x328   :  { %1693 = vmatpush3.bf16.msra.mxu1 %v1848_v25 }
 0x329   :  { %1694 = vmatprep.subr.bf16.mxu1 %v1849_v26 }
 0x32c   :  { %1695 = vmatpush3.bf16.msra.mxu1 %v1849_v26 }
 0x32d   :  { %1696 = vmatprep.subr.bf16.mxu1 %v1850_v27 }
 0x330   :  { %1697 = vmatpush3.bf16.msra.mxu1 %v1850_v27 }
 0x331   :  { %1698 = vmatprep.subr.bf16.mxu1 %v1851_v28 }
 0x334   :  { %1699 = vmatpush3.bf16.msra.mxu1 %v1851_v28 }
 0x335   :  { %1700 = vmatprep.subr.bf16.mxu1 %v1852_v29 }
 0x338   :  { %1701 = vmatpush3.bf16.msra.mxu1 %v1852_v29 }
 0x339   :  { %1702 = vmatprep.subr.bf16.mxu1 %v1853_v30 }
 0x33c   :  { %1703 = vmatpush3.bf16.msra.mxu1 %v1853_v30 }
 0x33d   :  { %1704 = vmatprep.subr.bf16.mxu1 %v1854_v46 }
 0x340   :  { %1705 = vmatpush3.bf16.msra.mxu1 %v1854_v46 }
 0x341   :  { %1706 = vmatprep.subr.bf16.mxu1 %v1855_v47 }
 0x344   :  { %1707 = vmatpush3.bf16.msra.mxu1 %v1855_v47 }
 0x345   :  { %1720 = vmatprep.subr.bf16.mxu1 %v1856_v62 }
 0x3fa   :  { %v1670_v33 = vpop.f32.mrb[4].mxu1 }
 0x3fb   :  { %v537_v35 = vadd.f32 %v1670_v33, %v533_v32  ;;  %v514_v36 = vpop.f32.mrb[5].mxu1  ;;  %v1863_v32 = vld [vmem:[#allocation10 + $0x138] sm:$0xff]   ;;  %v1864_v33 = vld [vmem:[#allocation10 + $0x140] sm:$0xff]  }
 0x3fc   :  { %v535_v38 = vadd.f32 %v531_v34, %v514_v36  ;;  %v1671_v39 = vpop.f32.mrb[6].mxu1  ;;  %v1865_v34 = vld [vmem:[#allocation10 + $0x148] sm:$0xff]   ;;  %v1867_v36 = vld [vmem:[#allocation10 + $0x158] sm:$0xff]  }
 0x3fd   :  { %v538_v41 = vadd.f32 %v1671_v39, %v534_v37  ;;  %v517_v42 = vpop.f32.mrb[7].mxu1  ;;  %v1868_v37 = vld [vmem:[#allocation10 + $0x160] sm:$0xff]  }
 0x3fe   :  { %v536_v43 = vadd.f32 %v532_v40, %v517_v42 }
 0x3ff   :  { %v540_v44 = vpack.c.bf16 %v538_v41, %v537_v35  ;;  %v1866_v35 = vld [vmem:[#allocation10 + $0x150] sm:$0xff]  }
 0x400   :  { %v539_v45 = vpack.c.bf16 %v536_v43, %v535_v38  ;;  %v859_v38 = vstv %s1483_s17 }
 0x402   :  { %1688 = vmatprep.mubr.bf16.mxu0 %v539_v45 }
 0x403   :  { %1689 = vmatmul.mubr.bf16.vlgmr.msra.gmra.mrb[8].mxu0 %v540_v44 }
 0x404   :  { %1716 = vmatprep.mubr.msk.bf16.mxu0 %vm145_vm0, %v2235_v6 }
 0x4d6   :  { %v1690_v49 = vpop.f32.mrb[8].mxu0 }
 0x4d7   :  { %v654_v50 = vadd.f32 %v1690_v49, %v1461_v48  ;;  %v645_v51 = vpop.f32.mrb[9].mxu0 }
 0x4d8   :  { %v646_v52 = vadd.f32 %v1461_v48, %v645_v51  ;;  %v1691_v53 = vpop.f32.mrb[10].mxu0 }
 0x4d9   :  { %v657_v54 = vadd.f32 %v1691_v53, %v1461_v48  ;;  %v648_v55 = vpop.f32.mrb[11].mxu0  ;;  %v662_v57 = vmax.f32 %v654_v50, 0.0  ;;  %v1870_v53 = vld [vmem:[#allocation10 + $0x170] sm:$0xff]  }
 0x4da   :  { %v649_v56 = vadd.f32 %v1461_v48, %v648_v55  ;;  %v660_v58 = vmax.f32 %v646_v52, 0.0  ;;  %v1484_v55 = vld [vmem:[%s2335_s5 + $0x8] ss:$0 sm:$0xff] }
 0x4db   :  { %v663_v6 = vmax.f32 %v657_v54, 0.0  ;;  %v1871_v54 = vld [vmem:[#allocation10 + $0x178] sm:$0xff]  }
 0x4dc   :  { %v661_v59 = vmax.f32 %v649_v56, 0.0 }
 0x4dd   :  { %v665_v60 = vpack.c.bf16 %v663_v6, %v662_v57 }
 0x4de   :  { %v664_v61 = vpack.c.bf16 %v661_v59, %v660_v58 }
 0x4e0   :  { %1708 = vmatprep.mubr.bf16.mxu1 %v664_v61 }
 0x4e1   :  { %1709 = vmatmul.mubr.bf16.vlgmr.msra.gmra.mrb[8].mxu1 %v665_v60 }
 0x4e2   :  { %1721 = vmatpush3.bf16.msra.mxu1 %v1856_v62 }
 0x4e3   :  { %1722 = vmatprep.subr.bf16.mxu1 %v1857_v63 }
 0x4e6   :  { %1723 = vmatpush3.bf16.msra.mxu1 %v1857_v63 }
 0x4e7   :  { %1724 = vmatprep.subr.bf16.mxu1 %v1858_v0 }
 0x4ea   :  { %1725 = vmatpush3.bf16.msra.mxu1 %v1858_v0 }
 0x4eb   :  { %1726 = vmatprep.subr.bf16.mxu1 %v1859_v1 }
 0x4ee   :  { %1727 = vmatpush3.bf16.msra.mxu1 %v1859_v1 }
 0x4ef   :  { %1728 = vmatprep.subr.bf16.mxu1 %v1860_v2 }
 0x4f2   :  { %1729 = vmatpush3.bf16.msra.mxu1 %v1860_v2 }
 0x4f3   :  { %1730 = vmatprep.subr.bf16.mxu1 %v1861_v3 }
 0x4f6   :  { %1731 = vmatpush3.bf16.msra.mxu1 %v1861_v3 }
 0x4f7   :  { %1732 = vmatprep.subr.bf16.mxu1 %v1862_v31 }
 0x4fa   :  { %1733 = vmatpush3.bf16.msra.mxu1 %v1862_v31 }
 0x4fb   :  { %1734 = vmatprep.subr.bf16.mxu1 %v1863_v32 }
 0x4fe   :  { %1735 = vmatpush3.bf16.msra.mxu1 %v1863_v32 }
 0x5b4   :  { %v1710_v5 = vpop.f32.mrb[8].mxu1 }
 0x5b5   :  { %v779_v7 = vadd.f32 %v1710_v5, %v1470_v4  ;;  %v770_v8 = vpop.f32.mrb[9].mxu1  ;;  %v2079_v5 = vmov 0.0  }
 0x5b6   :  { %v771_v11 = vadd.f32 %v1470_v4, %v770_v8  ;;  %v1711_v12 = vpop.f32.mrb[10].mxu1  ;;  %1760 = vmatprep.subr.bf16.mxu1 %v2079_v5  ;;  %v1873_v8 = vld [vmem:[#allocation12 + $0x8] sm:$0xff]  }
 0x5b7   :  { %v787_v13 = vmax.f32 %v779_v7, 0.0  ;;  %v782_v14 = vadd.f32 %v1711_v12, %v1470_v4  ;;  %v773_v15 = vpop.f32.mrb[11].mxu1  ;;  %v1872_v7 = vld [vmem:[#allocation12] sm:$0xff]  }
 0x5b8   :  { %v785_v16 = vmax.f32 %v771_v11, 0.0  ;;  %v774_v17 = vadd.f32 %v1470_v4, %v773_v15  ;;  %v1875_v11 = vld [vmem:[#allocation12 + $0x18] sm:$0xff]   ;;  %v1876_v12 = vld [vmem:[#allocation12 + $0x20] sm:$0xff]  }
 0x5b9   :  { %v796_v18 = vmul.f32 %v1479_v10, %v787_v13  ;;  %v788_v19 = vmax.f32 %v782_v14, 0.0  ;;  %v1877_v13 = vld [vmem:[#allocation12 + $0x28] sm:$0xff]   ;;  %v1878_v14 = vld [vmem:[#allocation12 + $0x30] sm:$0xff]   ;;  %v1493_v15 = vld [vmem:[%s2335_s5 + $0x9] ss:$0 sm:$0xff] }
 0x5ba   :  { %v794_v21 = vmul.f32 %v1479_v10, %v785_v16  ;;  %v786_v22 = vmax.f32 %v774_v17, 0.0 }
 0x5bb   :  { %v797_v23 = vmul.f32 %v1479_v10, %v788_v19  ;;  %v805_v25 = vadd.f32 %v1480_v20, %v796_v18  ;;  %v1502_v19 = vld [vmem:[%s2335_s5 + $0xa] ss:$0 sm:$0xff] }
 0x5bc   :  { %v795_v24 = vmul.f32 %v1479_v10, %v786_v22  ;;  %v803_v27 = vadd.f32 %v1480_v20, %v794_v21  ;;  %v1874_v10 = vld [vmem:[#allocation12 + $0x10] sm:$0xff]  }
 0x5bd   :  { %v806_v26 = vadd.f32 %v1480_v20, %v797_v23  ;;  %v862_v39 = vmul.f32 %v859_v38, %v805_v25 }
 0x5be   :  { %v804_v28 = vadd.f32 %v1480_v20, %v795_v24  ;;  %v860_v41 = vmul.f32 %v859_v38, %v803_v27 }
 0x5bf   :  { %v808_v29 = vpack.c.bf16 %v806_v26, %v805_v25  ;;  %v863_v44 = vmul.f32 %v859_v38, %v806_v26 }
 0x5c0   :  { %v807_v30 = vpack.c.bf16 %v804_v28, %v803_v27  ;;  %v861_v47 = vmul.f32 %v859_v38, %v804_v28 }
 0x5c2   :  { %1712 = vmatprep.subr.bf16.mxu0 %v807_v30 }
 0x5c3   :  { %1713 = vmatpush3.bf16.msra.mxu0 %v807_v30 }
 0x5c4   :  { %1714 = vmatprep.subr.bf16.mxu0 %v808_v29 }
 0x5c7   :  { %1715 = vmatpush3.bf16.msra.mxu0 %v808_v29  ;;  %v1503_v29 = vld [vmem:[%s2335_s5 + $0xb] ss:$0 sm:$0xff] }
 0x5c8   :  { %1740 = vmatprep.subr.bf16.mxu0 %v1864_v33 }
 0x5ca   :  { %1717 = vmatmul.mubr.msk.bf16.vlgmr.msra.gmra.mrb[12].mxu0 %vm145_vm0, %v2239_v9  ;;  %v1869_v9 = vld [vmem:[#allocation10 + $0x168] sm:$0xff]  }
 0x5cb   :  { %1741 = vmatpush3.bf16.msra.mxu0 %v1864_v33 }
 0x5cc   :  { %1742 = vmatprep.subr.bf16.mxu0 %v1865_v34 }
 0x5cf   :  { %1743 = vmatpush3.bf16.msra.mxu0 %v1865_v34 }
 0x5d0   :  { %1744 = vmatprep.subr.bf16.mxu0 %v1866_v35 }
 0x5d3   :  { %1745 = vmatpush3.bf16.msra.mxu0 %v1866_v35 }
 0x5d4   :  { %1746 = vmatprep.subr.bf16.mxu0 %v1867_v36 }
 0x5d7   :  { %1747 = vmatpush3.bf16.msra.mxu0 %v1867_v36 }
 0x5d8   :  { %1748 = vmatprep.subr.bf16.mxu0 %v1868_v37 }
 0x5db   :  { %1749 = vmatpush3.bf16.msra.mxu0 %v1868_v37 }
 0x5dc   :  { %1750 = vmatprep.subr.bf16.mxu0 %v1869_v9 }
 0x5df   :  { %1751 = vmatpush3.bf16.msra.mxu0 %v1869_v9 }
 0x5e0   :  { %1752 = vmatprep.subr.bf16.mxu0 %v1870_v53 }
 0x5e3   :  { %1753 = vmatpush3.bf16.msra.mxu0 %v1870_v53  ;;  %v1887_v53 = vld [vmem:[#allocation13 + $0x38] sm:$0xff]  }
 0x5e4   :  { %1754 = vmatprep.subr.bf16.mxu0 %v1871_v54 }
 0x5e7   :  { %1755 = vmatpush3.bf16.msra.mxu0 %v1871_v54  ;;  %v1505_v54 = vld [vmem:[%s2338_s8] ss:$0 sm:$0xff] }
 0x5e8   :  { %1768 = vmatprep.subr.bf16.mxu0 %v2079_v5 }
 0x69d   :  { %v1718_v40 = vpop.f32.mrb[12].mxu0 }
 0x69e   :  { %v866_v42 = vadd.f32 %v1718_v40, %v862_v39  ;;  %v843_v43 = vpop.f32.mrb[13].mxu0  ;;  %v1136_v39 = vld [vmem:[#allocation9] sm:$0xf] }
 0x69f   :  { %v864_v45 = vadd.f32 %v860_v41, %v843_v43  ;;  %v1719_v46 = vpop.f32.mrb[14].mxu0  ;;  %v1879_v40 = vld [vmem:[#allocation12 + $0x38] sm:$0xff]   ;;  %v1880_v41 = vld [vmem:[#allocation13] sm:$0xff]   ;;  %v1882_v43 = vld [vmem:[#allocation13 + $0x10] sm:$0xff]  }
 0x6a0   :  { %v867_v48 = vadd.f32 %v1719_v46, %v863_v44  ;;  %v846_v49 = vpop.f32.mrb[15].mxu0  ;;  %v1883_v44 = vld [vmem:[#allocation13 + $0x18] sm:$0xff]   ;;  %v1885_v46 = vld [vmem:[#allocation13 + $0x28] sm:$0xff]  }
 0x6a1   :  { %v865_v50 = vadd.f32 %v861_v47, %v846_v49 }
 0x6a2   :  { %v869_v51 = vpack.c.bf16 %v867_v48, %v866_v42  ;;  %v1881_v42 = vld [vmem:[#allocation13 + $0x8] sm:$0xff]  }
 0x6a3   :  { %v868_v52 = vpack.c.bf16 %v865_v50, %v864_v45  ;;  %v1884_v45 = vld [vmem:[#allocation13 + $0x20] sm:$0xff]  }
 0x6a5   :  { %1736 = vmatprep.mubr.bf16.mxu1 %v868_v52  ;;  %v1886_v52 = vld [vmem:[#allocation13 + $0x30] sm:$0xff]  }
 0x6a6   :  { %1737 = vmatmul.mubr.bf16.vlgmr.msra.gmra.mrb[12].mxu1 %v869_v51 }
 0x6a7   :  { %1764 = vmatprep.mubr.msk.bf16.mxu1 %vm2080_vm1, %v2079_v5 }
 0x779   :  { %v1738_v56 = vpop.f32.mrb[12].mxu1 }
 0x77a   :  { %v983_v57 = vadd.f32 %v1738_v56, %v1484_v55  ;;  %v974_v6 = vpop.f32.mrb[13].mxu1 }
 0x77b   :  { %v975_v58 = vadd.f32 %v1484_v55, %v974_v6  ;;  %v1739_v59 = vpop.f32.mrb[14].mxu1 }
 0x77c   :  { %v986_v60 = vadd.f32 %v1739_v59, %v1484_v55  ;;  %v977_v61 = vpop.f32.mrb[15].mxu1  ;;  %v991_v63 = vmax.f32 %v983_v57, 0.0 }
 0x77d   :  { %v978_v62 = vadd.f32 %v1484_v55, %v977_v61  ;;  %v989_v1 = vmax.f32 %v975_v58, 0.0  ;;  %v1514_v61 = vld [vmem:[%s2338_s8 + $0x1] ss:$0 sm:$0xff]  ;;  %s2034_s8 = scalar_lea.vmem %s1422_s1, 128 }
 0x77e   :  { %v992_v0 = vmax.f32 %v986_v60, 0.0  ;;  %p2035_p9 = scmp.ne.s32.totalorder %s1422_s1, %s2034_s8  ;;  %p2040_p11 = scmp.lt.s32.totalorder %s2034_s8, %s2034_s8 }
 0x77f   :  { %v990_v2 = vmax.f32 %v978_v62, 0.0 }
 0x780   :  { %v994_v3 = vpack.c.bf16 %v992_v0, %v991_v63  ;;  %p2041_p12 = por %p2040_p11, %p2039_p10 }
 0x781   :  { %v993_v4 = vpack.c.bf16 %v990_v2, %v989_v1 }
 0x782   :  { %p2042_p13 = pnand %p2041_p12, %p2035_p9 }
 0x783   :  { %1756 = vmatprep.mubr.bf16.mxu0 %v993_v4 }
 0x784   :  { %1757 = vmatmul.mubr.bf16.vlgmr.msra.gmra.mrb[16].mxu0 %v994_v3 }
 0x785   :  { %1784 = vmatprep.mubr.msk.bf16.mxu0 %vm2080_vm1, %v2079_v5  ;;  %1769 = vmatpush3.bf16.msra.mxu0 %v1872_v7 }
 0x786   :  { %1770 = vmatprep.subr.bf16.mxu0 %v2079_v5 }
 0x789   :  { %1771 = vmatpush3.bf16.msra.mxu0 %v1873_v8 }
 0x78a   :  { %1772 = vmatprep.subr.bf16.mxu0 %v2079_v5 }
 0x78d   :  { %1773 = vmatpush3.bf16.msra.mxu0 %v1874_v10 }
 0x78e   :  { %1774 = vmatprep.subr.bf16.mxu0 %v2079_v5 }
 0x791   :  { %1775 = vmatpush3.bf16.msra.mxu0 %v1875_v11 }
 0x792   :  { %1776 = vmatprep.subr.bf16.mxu0 %v2079_v5 }
 0x795   :  { %1777 = vmatpush3.bf16.msra.mxu0 %v1876_v12 }
 0x796   :  { %1778 = vmatprep.subr.bf16.mxu0 %v2079_v5 }
 0x799   :  { %1779 = vmatpush3.bf16.msra.mxu0 %v1877_v13 }
 0x79a   :  { %1780 = vmatprep.subr.bf16.mxu0 %v2079_v5 }
 0x79d   :  { %1781 = vmatpush3.bf16.msra.mxu0 %v1878_v14 }
 0x79e   :  { %1782 = vmatprep.subr.bf16.mxu0 %v2079_v5 }
 0x7a1   :  { %1783 = vmatpush3.bf16.msra.mxu0 %v1879_v40 }
 0x857   :  { %v1758_v16 = vpop.f32.mrb[16].mxu0 }
 0x858   :  { %v1108_v17 = vadd.f32 %v1758_v16, %v1493_v15  ;;  %v1099_v18 = vpop.f32.mrb[17].mxu0 }
 0x859   :  { %v1100_v20 = vadd.f32 %v1493_v15, %v1099_v18  ;;  %v1759_v21 = vpop.f32.mrb[18].mxu0 }
 0x85a   :  { %v1116_v22 = vmax.f32 %v1108_v17, 0.0  ;;  %v1111_v23 = vadd.f32 %v1759_v21, %v1493_v15  ;;  %v1102_v24 = vpop.f32.mrb[19].mxu0 }
 0x85b   :  { %v1114_v25 = vmax.f32 %v1100_v20, 0.0  ;;  %v1103_v26 = vadd.f32 %v1493_v15, %v1102_v24 }
 0x85c   :  { %v1125_v27 = vmul.f32 %v1502_v19, %v1116_v22  ;;  %v1117_v28 = vmax.f32 %v1111_v23, 0.0 }
 0x85d   :  { %v1123_v30 = vmul.f32 %v1502_v19, %v1114_v25  ;;  %v1115_v31 = vmax.f32 %v1103_v26, 0.0 }
 0x85e   :  { %v1126_v32 = vmul.f32 %v1502_v19, %v1117_v28  ;;  %v1134_v34 = vadd.f32 %v1503_v29, %v1125_v27 }
 0x85f   :  { %v1124_v33 = vmul.f32 %v1502_v19, %v1115_v31  ;;  %v1132_v36 = vadd.f32 %v1503_v29, %v1123_v30 }
 0x860   :  { %v1135_v35 = vadd.f32 %v1503_v29, %v1126_v32 }
 0x861   :  { %v1133_v37 = vadd.f32 %v1503_v29, %v1124_v33 }
 0x862   :  { %v1138_v9 = vpack.c.bf16 %v1135_v35, %v1134_v34 }
 0x863   :  { %v1137_v38 = vpack.c.bf16 %v1133_v37, %v1132_v36 }
 0x865   :  { %1761 = vmatpush3.bf16.msra.mxu1 %v1137_v38 }
 0x866   :  { %1762 = vmatprep.subr.bf16.mxu1 %v2079_v5 }
 0x869   :  { %1763 = vmatpush3.bf16.msra.mxu1 %v1138_v9 }
 0x86a   :  { %1788 = vmatprep.subr.bf16.mxu1 %v2079_v5 }
 0x86c   :  { %1765 = vmatmul.mubr.msk.bf16.vlgmr.msra.gmra.mrb[16].mxu1 %vm145_vm0, %v1136_v39 }
 0x86d   :  { %1804 = vmatprep.mubr.msk.bf16.mxu1 %vm2080_vm1, %v2079_v5  ;;  %1789 = vmatpush3.bf16.msra.mxu1 %v1880_v41 }
 0x86e   :  { %1790 = vmatprep.subr.bf16.mxu1 %v2079_v5 }
 0x871   :  { %1791 = vmatpush3.bf16.msra.mxu1 %v1881_v42 }
 0x872   :  { %1792 = vmatprep.subr.bf16.mxu1 %v2079_v5 }
 0x875   :  { %1793 = vmatpush3.bf16.msra.mxu1 %v1882_v43 }
 0x876   :  { %1794 = vmatprep.subr.bf16.mxu1 %v2079_v5 }
 0x879   :  { %1795 = vmatpush3.bf16.msra.mxu1 %v1883_v44 }
 0x87a   :  { %1796 = vmatprep.subr.bf16.mxu1 %v2079_v5 }
 0x87d   :  { %1797 = vmatpush3.bf16.msra.mxu1 %v1884_v45 }
 0x87e   :  { %1798 = vmatprep.subr.bf16.mxu1 %v2079_v5 }
 0x881   :  { %1799 = vmatpush3.bf16.msra.mxu1 %v1885_v46 }
 0x882   :  { %1800 = vmatprep.subr.bf16.mxu1 %v2079_v5 }
 0x885   :  { %1801 = vmatpush3.bf16.msra.mxu1 %v1886_v52 }
 0x886   :  { %1802 = vmatprep.subr.bf16.mxu1 %v2079_v5 }
 0x889   :  { %1803 = vmatpush3.bf16.msra.mxu1 %v1887_v53 }
 0x93f   :  { %v1176_v47 = vpop.f32.mrb[16].mxu1 }
 0x940   :  { %v1182_v48 = vpack.c.bf16 %v1176_v47, %v1176_v47  ;;  %v1766_v49 = vpop.f32.mrb[17].mxu1 }
 0x941   :  { %v1179_v50 = vpop.f32.mrb[18].mxu1 }
 0x942   :  { %v1767_v51 = vpop.f32.mrb[19].mxu1  ;;  %1785 = vmatmul.mubr.bf16.vlgmr.msra.gmra.mrb[20].mxu0 %v1182_v48 }
 0xa15   :  { %v1286_v55 = vpop.f32.mrb[20].mxu0 }
 0xa16   :  { %v1287_v56 = vadd.f32 %v1505_v54, %v1286_v55  ;;  %v1786_v57 = vpop.f32.mrb[21].mxu0 }
 0xa17   :  { %v1289_v6 = vpop.f32.mrb[22].mxu0 }
 0xa18   :  { %v1292_v58 = vmax.f32 %v1287_v56, 0.0  ;;  %v1787_v59 = vpop.f32.mrb[23].mxu0 }
 0xa1a   :  { %v1293_v60 = vpack.c.bf16 %v1292_v58, %v1292_v58 }
 0xa1c   :  { %1805 = vmatmul.mubr.bf16.vlgmr.msra.gmra.mrb[20].mxu1 %v1293_v60 }
 0xaef   :  { %v1397_v62 = vpop.f32.mrb[20].mxu1 }
 0xaf0   :  { %v1398_v63 = vadd.f32 %v1514_v61, %v1397_v62  ;;  %v1806_v0 = vpop.f32.mrb[21].mxu1 }
 0xaf1   :  { %v1400_v1 = vpop.f32.mrb[22].mxu1 }
 0xaf2   :  { %1403 = vmax.xlane.f32.xlu0 %v1398_v63  ;;  %v1807_v2 = vpop.f32.mrb[23].mxu1 }
 0xb7f   :  { %v1404_v3 = vpop.xlane.xlu0 %1403 }
 0xb80   :  { %v1405_v4 = vsub.f32 %v1398_v63, %v1404_v3 }
 0xb82   :  { %v1406_v5 = vmul.f32 1.442695, %v1405_v4 }
 0xb84   :  { %1888 = vpow2.f32 %v1406_v5 }
 0xb8e   :  { %v1889_v7 = vpop.eup %1888 }
 0xb8f   :  { %1408 = vadd.xlane.f32.xlu0 %v1889_v7 }
 0xc1c   :  { %v1409_v8 = vpop.xlane.xlu0 %1408 }
 0xc1d   :  { %1890 = vlog2.f32 %v1409_v8 }
 0xc27   :  { %v1891_v10 = vpop.eup %1890 }
 0xc28   :  { %v1411_v11 = vmul.f32 0.6931472, %v1891_v10 }
 0xc2a   :  { %v1412_v12 = vadd.f32 %v1411_v11, %v1404_v3 }
 0xc2c   :  { %v1413_v13 = vsub.f32 %v1398_v63, %v1412_v12 }
 0xc2e   :  { %1414 = vst [vmem:[#allocation15] sm:$0xff] %v1413_v13 }
 0xc2f   :  { %2045 = shalt.err (!%p2042_p13)
}
 0xc30   :  { %s2046_s29 = scalar_lea.hbm %s2339_s9, 128 }
 0xc31   :  { %p2047_p0 = scmp.ne.s32.totalorder %s2339_s9, %s2046_s29  ;;  %p2050_p1 = scmp.lt.u32.totalorder %s2046_s29, %s2339_s9 }
 0xc33   :  { %p2052_p2 = pnand %p2050_p1, %p2047_p0 }
 0xc35   :  { %2055 = shalt.err (!%p2052_p2)
}
 0xc36   :  { %1424 = dma.vmem_to_hbm [thread:$0]  %s1422_s1, 128, %s2339_s9, [#allocation4]  }
 0xc37   :  { %2066 = dma.done.wait [#allocation4], 128  }
 0xc38   :  { %2067 = vsyncadd [#allocation4], 4294967168 }
 0xc39   :  { %1428 = vsyncpa [#allocation3], 1 }
 0xc3a   :  { %1429 = vsyncpa [#allocation8], 1 }
 0xc3b   :  { %1430 = vsyncpa [#allocation11], 1 }
 0xc3c   :  { %1431 = vsyncpa [#allocation14], 1 }
 0xc3d   :  { %1432 = vsyncpa [#allocation4], 1 }
 0xc3e   :  { %1433 = vsyncpa [#allocation5], 1 }

</bundles_post_ra>
